<compile_context>
chip_gen: v7x
topology: tpu7x:2x2x1
jax: 0.10.0
libtpu: 0.0.40
codegen_flags: <defaults>
</compile_context>

<pallas_src>
import math
import functools

import jax
import jax.numpy as jnp
from jax import lax
from jax.experimental import pallas as pl
from jax.experimental.pallas import tpu as pltpu

_LN_EPS = 1e-5
_GELU_C = math.sqrt(2.0 / math.pi)
_VMEM_LIMIT_BYTES = 48 * 1024 * 1024


# --------------------------------------------------------------------------
# Kernel A: LayerNorm-1 + QKV projection (q pre-scaled by 1/sqrt(hs))
# --------------------------------------------------------------------------
def _ln_qkv_kernel(x_ref, g_ref, b_ref, wq_ref, wk_ref, wv_ref,
                   bq_ref, bk_ref, bv_ref, q_ref, k_ref, v_ref,
                   *, scale, eps):
    x = x_ref[0].astype(jnp.float32)                      # (tr, C)
    mu = jnp.mean(x, axis=-1, keepdims=True)
    xc = x - mu
    var = jnp.mean(xc * xc, axis=-1, keepdims=True)
    xn = xc / jnp.sqrt(var + eps)
    xn = xn * g_ref[0] + b_ref[0]                         # LN1 (f32)

    xn_c = xn.astype(wq_ref.dtype)                        # bf16 MXU feed
    q = jnp.dot(xn_c, wq_ref[...], preferred_element_type=jnp.float32) + bq_ref[0]
    k = jnp.dot(xn_c, wk_ref[...], preferred_element_type=jnp.float32) + bk_ref[0]
    v = jnp.dot(xn_c, wv_ref[...], preferred_element_type=jnp.float32) + bv_ref[0]

    q_ref[0] = (q * scale).astype(q_ref.dtype)            # fold 1/sqrt(hs) into q
    k_ref[0] = k.astype(k_ref.dtype)
    v_ref[0] = v.astype(v_ref.dtype)


# --------------------------------------------------------------------------
# Kernel B: flash-style causal attention (online softmax, KV-tiled)
# --------------------------------------------------------------------------
def _flash_attn_kernel(q_ref, k_ref, v_ref, o_ref, m_sc, l_sc, acc_sc,
                       *, block_q, block_k, approx_recip):
    qi = pl.program_id(2)
    ki = pl.program_id(3)
    nk = pl.num_programs(3)

    @pl.when(ki == 0)
    def _init():
        m_sc[...] = jnp.full_like(m_sc, -jnp.inf)
        l_sc[...] = jnp.zeros_like(l_sc)
        acc_sc[...] = jnp.zeros_like(acc_sc)

    # Skip KV tiles that lie entirely above the causal diagonal.
    @pl.when(ki * block_k <= qi * block_q + (block_q - 1))
    def _compute():
        q = q_ref[0, 0]                                   # (tq, hs), already scaled
        k = k_ref[0, 0]                                   # (tk, hs)
        v = v_ref[0, 0]                                   # (tk, hs)

        s = lax.dot_general(q, k, (((1,), (1,)), ((), ())),
                            preferred_element_type=jnp.float32)   # (tq, tk)

        row = qi * block_q + lax.broadcasted_iota(jnp.int32, s.shape, 0)
        col = ki * block_k + lax.broadcasted_iota(jnp.int32, s.shape, 1)
        s = jnp.where(row >= col, s, jnp.float32(-1e30))

        m_prev = m_sc[...]                                # (tq, 1)
        m_new = jnp.maximum(m_prev, jnp.max(s, axis=-1, keepdims=True))
        alpha = jnp.exp(m_prev - m_new)
        p = jnp.exp(s - m_new)                            # f32

        l_sc[...] = alpha * l_sc[...] + jnp.sum(p, axis=-1, keepdims=True)
        acc_sc[...] = alpha * acc_sc[...] + jnp.dot(
            p.astype(v.dtype), v, preferred_element_type=jnp.float32)
        m_sc[...] = m_new

    @pl.when(ki == nk - 1)
    def _finalize():
        l = l_sc[...]
        inv = pl.reciprocal(l, approx=True) if approx_recip else 1.0 / l
        o_ref[0, 0] = (acc_sc[...] * inv).astype(o_ref.dtype)


# --------------------------------------------------------------------------
# Kernel C: c_proj + residual + LayerNorm-2 + MLP (NewGELU) + residual
# --------------------------------------------------------------------------
def _proj_mlp_kernel(y_ref, x_ref, wp_ref, bp_ref, g2_ref, b2_ref,
                     wfc_ref, bfc_ref, wmp_ref, bmp_ref, o_ref, *, eps):
    y = y_ref[0]                                          # (tr, C) attn heads merged
    x = x_ref[0].astype(jnp.float32)                      # (tr, C) residual input

    attn = jnp.dot(y, wp_ref[...], preferred_element_type=jnp.float32) + bp_ref[0]
    x1 = x + attn                                         # residual 1 (f32)

    mu = jnp.mean(x1, axis=-1, keepdims=True)
    xc = x1 - mu
    var = jnp.mean(xc * xc, axis=-1, keepdims=True)
    xn = (xc / jnp.sqrt(var + eps)) * g2_ref[0] + b2_ref[0]

    h = jnp.dot(xn.astype(wfc_ref.dtype), wfc_ref[...],
                preferred_element_type=jnp.float32) + bfc_ref[0]     # (tr, 4C)
    h = 0.5 * h * (1.0 + jnp.tanh(_GELU_C * (h + 0.044715 * h * h * h)))  # NewGELU

    m = jnp.dot(h.astype(wmp_ref.dtype), wmp_ref[...],
                preferred_element_type=jnp.float32) + bmp_ref[0]     # (tr, C)

    o_ref[0] = (x1 + m).astype(o_ref.dtype)               # residual 2, lane-dense store


# --------------------------------------------------------------------------
# Wrapper: full Block forward
# --------------------------------------------------------------------------
def gpt2_block(x, params, *, n_head, use_bf16=True):
    """x: (B, T, C) f32.  params: PyTorch-layout weights (out_features, in_features)."""
    B, T, C = x.shape
    assert C % n_head == 0
    hs = C // n_head
    cdt = jnp.bfloat16 if use_bf16 else jnp.float32

    def _tile(t):
        b = t if t <= 128 else 128
        assert t % b == 0, "T must be <=128 or a multiple of 128"
        return b

    tr = _tile(T)          # row tile for LN/MLP kernels
    tq = _tile(T)          # q tile
    tk = _tile(T)          # kv tile

    # ---- weight prep (PyTorch (out, in) -> (in, out)); matmul operands in cdt ----
    w_attn_t = params["w_attn"].T                                       # (C, 3C)
    wq = w_attn_t[:, 0 * C:1 * C].astype(cdt)
    wk = w_attn_t[:, 1 * C:2 * C].astype(cdt)
    wv = w_attn_t[:, 2 * C:3 * C].astype(cdt)
    bq = params["b_attn"][0 * C:1 * C].reshape(1, C).astype(jnp.float32)
    bk = params["b_attn"][1 * C:2 * C].reshape(1, C).astype(jnp.float32)
    bv = params["b_attn"][2 * C:3 * C].reshape(1, C).astype(jnp.float32)

    w_cproj = params["w_cproj"].T.astype(cdt)                           # (C, C)
    b_cproj = params["b_cproj"].reshape(1, C).astype(jnp.float32)
    w_fc = params["w_fc"].T.astype(cdt)                                 # (C, 4C)
    b_fc = params["b_fc"].reshape(1, 4 * C).astype(jnp.float32)
    w_mproj = params["w_mproj"].T.astype(cdt)                           # (4C, C)
    b_mproj = params["b_mproj"].reshape(1, C).astype(jnp.float32)

    g1 = params["ln1_g"].reshape(1, C).astype(jnp.float32)
    b1 = params["ln1_b"].reshape(1, C).astype(jnp.float32)
    g2 = params["ln2_g"].reshape(1, C).astype(jnp.float32)
    b2 = params["ln2_b"].reshape(1, C).astype(jnp.float32)

    cparams_2d = pltpu.CompilerParams(
        dimension_semantics=("parallel", "parallel"),
        vmem_limit_bytes=_VMEM_LIMIT_BYTES)

    # ---- Kernel A: LN1 + QKV projection ----
    qkv_kernel = functools.partial(_ln_qkv_kernel,
                                   scale=1.0 / math.sqrt(hs), eps=_LN_EPS)
    q, k, v = pl.pallas_call(
        qkv_kernel,
        out_shape=(jax.ShapeDtypeStruct((B, T, C), cdt),
                   jax.ShapeDtypeStruct((B, T, C), cdt),
                   jax.ShapeDtypeStruct((B, T, C), cdt)),
        grid=(B, T // tr),
        in_specs=[
            pl.BlockSpec((1, tr, C), lambda b, r: (b, r, 0)),    # x
            pl.BlockSpec((1, C), lambda b, r: (0, 0)),           # ln1 gamma
            pl.BlockSpec((1, C), lambda b, r: (0, 0)),           # ln1 beta
            pl.BlockSpec((C, C), lambda b, r: (0, 0)),           # w_q
            pl.BlockSpec((C, C), lambda b, r: (0, 0)),           # w_k
            pl.BlockSpec((C, C), lambda b, r: (0, 0)),           # w_v
            pl.BlockSpec((1, C), lambda b, r: (0, 0)),           # b_q
            pl.BlockSpec((1, C), lambda b, r: (0, 0)),           # b_k
            pl.BlockSpec((1, C), lambda b, r: (0, 0)),           # b_v
        ],
        out_specs=(pl.BlockSpec((1, tr, C), lambda b, r: (b, r, 0)),
                   pl.BlockSpec((1, tr, C), lambda b, r: (b, r, 0)),
                   pl.BlockSpec((1, tr, C), lambda b, r: (b, r, 0))),
        compiler_params=cparams_2d,
    )(x, g1, b1, wq, wk, wv, bq, bk, bv)

    # Layout plumbing: (B, T, C) -> (B, H, T, hs) so head dim sits on the grid.
    qh = q.reshape(B, T, n_head, hs).transpose(0, 2, 1, 3)
    kh = k.reshape(B, T, n_head, hs).transpose(0, 2, 1, 3)
    vh = v.reshape(B, T, n_head, hs).transpose(0, 2, 1, 3)

    # ---- Kernel B: flash attention ----
    flash = functools.partial(_flash_attn_kernel, block_q=tq, block_k=tk,
                              approx_recip=use_bf16)
    o = pl.pallas_call(
        flash,
        out_shape=jax.ShapeDtypeStruct((B, n_head, T, hs), cdt),
        grid=(B, n_head, T // tq, T // tk),
        in_specs=[
            pl.BlockSpec((1, 1, tq, hs), lambda b, h, qi, ki: (b, h, qi, 0)),
            pl.BlockSpec((1, 1, tk, hs), lambda b, h, qi, ki: (b, h, ki, 0)),
            pl.BlockSpec((1, 1, tk, hs), lambda b, h, qi, ki: (b, h, ki, 0)),
        ],
        out_specs=pl.BlockSpec((1, 1, tq, hs), lambda b, h, qi, ki: (b, h, qi, 0)),
        scratch_shapes=[
            pltpu.VMEM((tq, 1), jnp.float32),     # m (running max)
            pltpu.VMEM((tq, 1), jnp.float32),     # l (running denom)
            pltpu.VMEM((tq, hs), jnp.float32),    # acc
        ],
        compiler_params=pltpu.CompilerParams(
            dimension_semantics=("parallel", "parallel", "parallel", "arbitrary"),
            vmem_limit_bytes=_VMEM_LIMIT_BYTES),
    )(qh, kh, vh)

    # Merge heads back: (B, H, T, hs) -> (B, T, C).
    y = o.transpose(0, 2, 1, 3).reshape(B, T, C)

    # ---- Kernel C: c_proj + residual + LN2 + MLP + residual ----
    mlp_kernel = functools.partial(_proj_mlp_kernel, eps=_LN_EPS)
    out = pl.pallas_call(
        mlp_kernel,
        out_shape=jax.ShapeDtypeStruct((B, T, C), x.dtype),
        grid=(B, T // tr),
        in_specs=[
            pl.BlockSpec((1, tr, C), lambda b, r: (b, r, 0)),    # attn y
            pl.BlockSpec((1, tr, C), lambda b, r: (b, r, 0)),    # x (residual)
            pl.BlockSpec((C, C), lambda b, r: (0, 0)),           # w_cproj
            pl.BlockSpec((1, C), lambda b, r: (0, 0)),           # b_cproj
            pl.BlockSpec((1, C), lambda b, r: (0, 0)),           # ln2 gamma
            pl.BlockSpec((1, C), lambda b, r: (0, 0)),           # ln2 beta
            pl.BlockSpec((C, 4 * C), lambda b, r: (0, 0)),       # w_fc
            pl.BlockSpec((1, 4 * C), lambda b, r: (0, 0)),       # b_fc
            pl.BlockSpec((4 * C, C), lambda b, r: (0, 0)),       # w_mproj
            pl.BlockSpec((1, C), lambda b, r: (0, 0)),           # b_mproj
        ],
        out_specs=pl.BlockSpec((1, tr, C), lambda b, r: (b, r, 0)),
        compiler_params=cparams_2d,
    )(y, x, w_cproj, b_cproj, g2, b2, w_fc, b_fc, w_mproj, b_mproj)

    return out


# --------------------------------------------------------------------------
# Pure-JAX reference mirroring the PyTorch Block forward (eval mode, f32)
# --------------------------------------------------------------------------
def _block_reference(x, p, n_head):
    B, T, C = x.shape
    hs = C // n_head

    def ln(z, g, b):
        mu = z.mean(-1, keepdims=True)
        var = ((z - mu) ** 2).mean(-1, keepdims=True)
        return (z - mu) / jnp.sqrt(var + _LN_EPS) * g + b

    xn = ln(x, p["ln1_g"], p["ln1_b"])
    qkv = xn @ p["w_attn"].T + p["b_attn"]
    q, k, v = jnp.split(qkv, 3, axis=-1)
    q = q.reshape(B, T, n_head, hs).transpose(0, 2, 1, 3)
    k = k.reshape(B, T, n_head, hs).transpose(0, 2, 1, 3)
    v = v.reshape(B, T, n_head, hs).transpose(0, 2, 1, 3)
    att = jnp.einsum("bhqd,bhkd->bhqk", q, k) / math.sqrt(hs)
    mask = jnp.tril(jnp.ones((T, T), dtype=bool))
    att = jnp.where(mask[None, None], att, -jnp.inf)
    att = jax.nn.softmax(att, axis=-1)
    yh = jnp.einsum("bhqk,bhkd->bhqd", att, v)
    yh = yh.transpose(0, 2, 1, 3).reshape(B, T, C)
    x = x + yh @ p["w_cproj"].T + p["b_cproj"]

    xn2 = ln(x, p["ln2_g"], p["ln2_b"])
    h = xn2 @ p["w_fc"].T + p["b_fc"]
    h = 0.5 * h * (1.0 + jnp.tanh(_GELU_C * (h + 0.044715 * h ** 3)))
    return x + h @ p["w_mproj"].T + p["b_mproj"]


if __name__ == "__main__":
    # Config: block_size >= T, n_embd = 32, n_head = 4
    B, T, C, n_head = 2, 8, 32, 4

    key = jax.random.PRNGKey(0)
    ks = jax.random.split(key, 16)

    x = jax.random.normal(ks[0], (B, T, C), dtype=jnp.float32)

    def init_linear(kw, kb, fan_in, fan_out):
        w = jax.random.normal(kw, (fan_out, fan_in), jnp.float32) / math.sqrt(fan_in)
        b = jax.random.normal(kb, (fan_out,), jnp.float32) * 0.02
        return w, b

    w_attn, b_attn = init_linear(ks[1], ks[2], C, 3 * C)       # c_attn
    w_cproj, b_cproj = init_linear(ks[3], ks[4], C, C)         # attn c_proj
    w_fc, b_fc = init_linear(ks[5], ks[6], C, 4 * C)           # mlp c_fc
    w_mproj, b_mproj = init_linear(ks[7], ks[8], 4 * C, C)     # mlp c_proj

    params = dict(
        ln1_g=1.0 + 0.05 * jax.random.normal(ks[9], (C,), jnp.float32),
        ln1_b=0.05 * jax.random.normal(ks[10], (C,), jnp.float32),
        w_attn=w_attn, b_attn=b_attn,
        w_cproj=w_cproj, b_cproj=b_cproj,
        ln2_g=1.0 + 0.05 * jax.random.normal(ks[11], (C,), jnp.float32),
        ln2_b=0.05 * jax.random.normal(ks[12], (C,), jnp.float32),
        w_fc=w_fc, b_fc=b_fc,
        w_mproj=w_mproj, b_mproj=b_mproj,
    )

    ref = _block_reference(x, params, n_head)

    # f32 path: tight correctness check.
    out_f32 = jax.block_until_ready(
        gpt2_block(x, params, n_head=n_head, use_bf16=False))
    assert out_f32.shape == (B, T, C)
    assert jnp.allclose(out_f32, ref, atol=1e-3, rtol=1e-3), "f32 mismatch vs reference"

    # bf16 MXU path (default perf mode): looser tolerance due to bf16 operands.
    out_bf16 = jax.block_until_ready(
        gpt2_block(x, params, n_head=n_head, use_bf16=True))
    assert out_bf16.shape == (B, T, C)
    assert jnp.allclose(out_bf16, ref, atol=0.1, rtol=0.1), "bf16 mismatch vs reference"

    print("KERNEL_OK")
</pallas_src>

<mosaic_0001>
module attributes {stable_mosaic.version = 11 : i64} {
  func.func @_ln_qkv_kernel(%arg0: i32, %arg1: i32, %arg2: memref<1x8x32xf32, #tpu.memory_space<vmem>>, %arg3: memref<1x32xf32, #tpu.memory_space<vmem>>, %arg4: memref<1x32xf32, #tpu.memory_space<vmem>>, %arg5: memref<32x32xf32, #tpu.memory_space<vmem>>, %arg6: memref<32x32xf32, #tpu.memory_space<vmem>>, %arg7: memref<32x32xf32, #tpu.memory_space<vmem>>, %arg8: memref<1x32xf32, #tpu.memory_space<vmem>>, %arg9: memref<1x32xf32, #tpu.memory_space<vmem>>, %arg10: memref<1x32xf32, #tpu.memory_space<vmem>>, %arg11: memref<1x8x32xf32, #tpu.memory_space<vmem>>, %arg12: memref<1x8x32xf32, #tpu.memory_space<vmem>>, %arg13: memref<1x8x32xf32, #tpu.memory_space<vmem>>) attributes {dimension_semantics = [#tpu.dimension_semantics<parallel>, #tpu.dimension_semantics<parallel>], iteration_bounds = array<i64: 2, 1>, scalar_prefetch = 0 : i64, scratch_operands = 0 : i64, tpu.core_type = #tpu.core_type<tc>, window_params = [{transform_indices = @transform_0, window_bounds = array<i64: 1, 8, 32>}, {pipeline_mode = #tpu.pipeline_mode<synchronous>, transform_indices = @transform_1, window_bounds = array<i64: 1, 32>}, {pipeline_mode = #tpu.pipeline_mode<synchronous>, transform_indices = @transform_2, window_bounds = array<i64: 1, 32>}, {pipeline_mode = #tpu.pipeline_mode<synchronous>, transform_indices = @transform_3, window_bounds = array<i64: 32, 32>}, {pipeline_mode = #tpu.pipeline_mode<synchronous>, transform_indices = @transform_4, window_bounds = array<i64: 32, 32>}, {pipeline_mode = #tpu.pipeline_mode<synchronous>, transform_indices = @transform_5, window_bounds = array<i64: 32, 32>}, {pipeline_mode = #tpu.pipeline_mode<synchronous>, transform_indices = @transform_6, window_bounds = array<i64: 1, 32>}, {pipeline_mode = #tpu.pipeline_mode<synchronous>, transform_indices = @transform_7, window_bounds = array<i64: 1, 32>}, {pipeline_mode = #tpu.pipeline_mode<synchronous>, transform_indices = @transform_8, window_bounds = array<i64: 1, 32>}, {transform_indices = @transform_9, window_bounds = array<i64: 1, 8, 32>}, {transform_indices = @transform_10, window_bounds = array<i64: 1, 8, 32>}, {transform_indices = @transform_11, window_bounds = array<i64: 1, 8, 32>}]} {
    %c0 = arith.constant 0 : index
    %c0_0 = arith.constant 0 : index
    %c0_1 = arith.constant 0 : index
    %0 = vector.load %arg2[%c0, %c0_0, %c0_1] : memref<1x8x32xf32, #tpu.memory_space<vmem>>, vector<1x8x32xf32>
    %1 = vector.shape_cast %0 : vector<1x8x32xf32> to vector<8x32xf32>
    %cst = arith.constant dense<0.000000e+00> : vector<8xf32>
    %2 = vector.multi_reduction <add>, %1, %cst [1] : vector<8x32xf32> to vector<8xf32>
    %3 = vector.shape_cast %2 : vector<8xf32> to vector<8x1xf32>
    %cst_2 = arith.constant 3.200000e+01 : f32
    %4 = vector.broadcast %cst_2 : f32 to vector<8x1xf32>
    %5 = arith.divf %3, %4 : vector<8x1xf32>
    %6 = vector.broadcast %5 : vector<8x1xf32> to vector<8x32xf32>
    %7 = arith.subf %1, %6 : vector<8x32xf32>
    %8 = arith.mulf %7, %7 : vector<8x32xf32>
    %cst_3 = arith.constant dense<0.000000e+00> : vector<8xf32>
    %9 = vector.multi_reduction <add>, %8, %cst_3 [1] : vector<8x32xf32> to vector<8xf32>
    %10 = vector.shape_cast %9 : vector<8xf32> to vector<8x1xf32>
    %cst_4 = arith.constant 3.200000e+01 : f32
    %11 = vector.broadcast %cst_4 : f32 to vector<8x1xf32>
    %12 = arith.divf %10, %11 : vector<8x1xf32>
    %cst_5 = arith.constant 9.99999974E-6 : f32
    %13 = vector.broadcast %cst_5 : f32 to vector<8x1xf32>
    %14 = arith.addf %12, %13 : vector<8x1xf32>
    %15 = math.sqrt %14 : vector<8x1xf32>
    %16 = vector.broadcast %15 : vector<8x1xf32> to vector<8x32xf32>
    %17 = arith.divf %7, %16 : vector<8x32xf32>
    %c0_6 = arith.constant 0 : index
    %c0_7 = arith.constant 0 : index
    %18 = vector.load %arg3[%c0_6, %c0_7] : memref<1x32xf32, #tpu.memory_space<vmem>>, vector<1x32xf32>
    %19 = vector.shape_cast %18 : vector<1x32xf32> to vector<32xf32>
    %20 = vector.shape_cast %19 : vector<32xf32> to vector<1x32xf32>
    %21 = vector.broadcast %20 : vector<1x32xf32> to vector<8x32xf32>
    %22 = arith.mulf %17, %21 : vector<8x32xf32>
    %c0_8 = arith.constant 0 : index
    %c0_9 = arith.constant 0 : index
    %23 = vector.load %arg4[%c0_8, %c0_9] : memref<1x32xf32, #tpu.memory_space<vmem>>, vector<1x32xf32>
    %24 = vector.shape_cast %23 : vector<1x32xf32> to vector<32xf32>
    %25 = vector.shape_cast %24 : vector<32xf32> to vector<1x32xf32>
    %26 = vector.broadcast %25 : vector<1x32xf32> to vector<8x32xf32>
    %27 = arith.addf %22, %26 : vector<8x32xf32>
    %c0_10 = arith.constant 0 : index
    %c0_11 = arith.constant 0 : index
    %28 = vector.load %arg5[%c0_10, %c0_11] : memref<32x32xf32, #tpu.memory_space<vmem>>, vector<32x32xf32>
    %cst_12 = arith.constant dense<0.000000e+00> : vector<8x32xf32>
    %29 = tpu.matmul %27, %28, %cst_12 {dimension_numbers = #tpu.dot_dimension_numbers<[1], [0], [0], [1], [0, 0, 1, 1], [], []>} : vector<8x32xf32>, vector<32x32xf32>, vector<8x32xf32> -> vector<8x32xf32>
    %c0_13 = arith.constant 0 : index
    %c0_14 = arith.constant 0 : index
    %30 = vector.load %arg8[%c0_13, %c0_14] : memref<1x32xf32, #tpu.memory_space<vmem>>, vector<1x32xf32>
    %31 = vector.shape_cast %30 : vector<1x32xf32> to vector<32xf32>
    %32 = vector.shape_cast %31 : vector<32xf32> to vector<1x32xf32>
    %33 = vector.broadcast %32 : vector<1x32xf32> to vector<8x32xf32>
    %34 = arith.addf %29, %33 : vector<8x32xf32>
    %c0_15 = arith.constant 0 : index
    %c0_16 = arith.constant 0 : index
    %35 = vector.load %arg6[%c0_15, %c0_16] : memref<32x32xf32, #tpu.memory_space<vmem>>, vector<32x32xf32>
    %cst_17 = arith.constant dense<0.000000e+00> : vector<8x32xf32>
    %36 = tpu.matmul %27, %35, %cst_17 {dimension_numbers = #tpu.dot_dimension_numbers<[1], [0], [0], [1], [0, 0, 1, 1], [], []>} : vector<8x32xf32>, vector<32x32xf32>, vector<8x32xf32> -> vector<8x32xf32>
    %c0_18 = arith.constant 0 : index
    %c0_19 = arith.constant 0 : index
    %37 = vector.load %arg9[%c0_18, %c0_19] : memref<1x32xf32, #tpu.memory_space<vmem>>, vector<1x32xf32>
    %38 = vector.shape_cast %37 : vector<1x32xf32> to vector<32xf32>
    %39 = vector.shape_cast %38 : vector<32xf32> to vector<1x32xf32>
    %40 = vector.broadcast %39 : vector<1x32xf32> to vector<8x32xf32>
    %41 = arith.addf %36, %40 : vector<8x32xf32>
    %c0_20 = arith.constant 0 : index
    %c0_21 = arith.constant 0 : index
    %42 = vector.load %arg7[%c0_20, %c0_21] : memref<32x32xf32, #tpu.memory_space<vmem>>, vector<32x32xf32>
    %cst_22 = arith.constant dense<0.000000e+00> : vector<8x32xf32>
    %43 = tpu.matmul %27, %42, %cst_22 {dimension_numbers = #tpu.dot_dimension_numbers<[1], [0], [0], [1], [0, 0, 1, 1], [], []>} : vector<8x32xf32>, vector<32x32xf32>, vector<8x32xf32> -> vector<8x32xf32>
    %c0_23 = arith.constant 0 : index
    %c0_24 = arith.constant 0 : index
    %44 = vector.load %arg10[%c0_23, %c0_24] : memref<1x32xf32, #tpu.memory_space<vmem>>, vector<1x32xf32>
    %45 = vector.shape_cast %44 : vector<1x32xf32> to vector<32xf32>
    %46 = vector.shape_cast %45 : vector<32xf32> to vector<1x32xf32>
    %47 = vector.broadcast %46 : vector<1x32xf32> to vector<8x32xf32>
    %48 = arith.addf %43, %47 : vector<8x32xf32>
    %cst_25 = arith.constant 0.353553385 : f32
    %49 = vector.broadcast %cst_25 : f32 to vector<8x32xf32>
    %50 = arith.mulf %34, %49 : vector<8x32xf32>
    %c0_26 = arith.constant 0 : index
    %c0_27 = arith.constant 0 : index
    %c0_28 = arith.constant 0 : index
    %51 = vector.load %arg11[%c0_26, %c0_27, %c0_28] : memref<1x8x32xf32, #tpu.memory_space<vmem>>, vector<1x8x32xf32>
    %52 = vector.shape_cast %51 : vector<1x8x32xf32> to vector<8x32xf32>
    %53 = vector.shape_cast %50 : vector<8x32xf32> to vector<1x8x32xf32>
    tpu.vector_store %arg11[%c0_26, %c0_27, %c0_28], %53 {strides = array<i32>} : memref<1x8x32xf32, #tpu.memory_space<vmem>>, vector<1x8x32xf32>,
    %c0_29 = arith.constant 0 : index
    %c0_30 = arith.constant 0 : index
    %c0_31 = arith.constant 0 : index
    %54 = vector.load %arg12[%c0_29, %c0_30, %c0_31] : memref<1x8x32xf32, #tpu.memory_space<vmem>>, vector<1x8x32xf32>
    %55 = vector.shape_cast %54 : vector<1x8x32xf32> to vector<8x32xf32>
    %56 = vector.shape_cast %41 : vector<8x32xf32> to vector<1x8x32xf32>
    tpu.vector_store %arg12[%c0_29, %c0_30, %c0_31], %56 {strides = array<i32>} : memref<1x8x32xf32, #tpu.memory_space<vmem>>, vector<1x8x32xf32>,
    %c0_32 = arith.constant 0 : index
    %c0_33 = arith.constant 0 : index
    %c0_34 = arith.constant 0 : index
    %57 = vector.load %arg13[%c0_32, %c0_33, %c0_34] : memref<1x8x32xf32, #tpu.memory_space<vmem>>, vector<1x8x32xf32>
    %58 = vector.shape_cast %57 : vector<1x8x32xf32> to vector<8x32xf32>
    %59 = vector.shape_cast %48 : vector<8x32xf32> to vector<1x8x32xf32>
    tpu.vector_store %arg13[%c0_32, %c0_33, %c0_34], %59 {strides = array<i32>} : memref<1x8x32xf32, #tpu.memory_space<vmem>>, vector<1x8x32xf32>,
    return
  }
  func.func @transform_0(%arg0: i32, %arg1: i32) -> (i32, i32, i32) {
    %c0_i32 = arith.constant 0 : i32
    %c0_i32_0 = arith.constant 0 : i32
    return %arg0, %arg1, %c0_i32 : i32, i32, i32
  }
  func.func @transform_1(%arg0: i32, %arg1: i32) -> (i32, i32) {
    %c0_i32 = arith.constant 0 : i32
    %c0_i32_0 = arith.constant 0 : i32
    %c0_i32_1 = arith.constant 0 : i32
    return %c0_i32, %c0_i32_0 : i32, i32
  }
  func.func @transform_2(%arg0: i32, %arg1: i32) -> (i32, i32) {
    %c0_i32 = arith.constant 0 : i32
    %c0_i32_0 = arith.constant 0 : i32
    %c0_i32_1 = arith.constant 0 : i32
    return %c0_i32, %c0_i32_0 : i32, i32
  }
  func.func @transform_3(%arg0: i32, %arg1: i32) -> (i32, i32) {
    %c0_i32 = arith.constant 0 : i32
    %c0_i32_0 = arith.constant 0 : i32
    %c0_i32_1 = arith.constant 0 : i32
    return %c0_i32, %c0_i32_0 : i32, i32
  }
  func.func @transform_4(%arg0: i32, %arg1: i32) -> (i32, i32) {
    %c0_i32 = arith.constant 0 : i32
    %c0_i32_0 = arith.constant 0 : i32
    %c0_i32_1 = arith.constant 0 : i32
    return %c0_i32, %c0_i32_0 : i32, i32
  }
  func.func @transform_5(%arg0: i32, %arg1: i32) -> (i32, i32) {
    %c0_i32 = arith.constant 0 : i32
    %c0_i32_0 = arith.constant 0 : i32
    %c0_i32_1 = arith.constant 0 : i32
    return %c0_i32, %c0_i32_0 : i32, i32
  }
  func.func @transform_6(%arg0: i32, %arg1: i32) -> (i32, i32) {
    %c0_i32 = arith.constant 0 : i32
    %c0_i32_0 = arith.constant 0 : i32
    %c0_i32_1 = arith.constant 0 : i32
    return %c0_i32, %c0_i32_0 : i32, i32
  }
  func.func @transform_7(%arg0: i32, %arg1: i32) -> (i32, i32) {
    %c0_i32 = arith.constant 0 : i32
    %c0_i32_0 = arith.constant 0 : i32
    %c0_i32_1 = arith.constant 0 : i32
    return %c0_i32, %c0_i32_0 : i32, i32
  }
  func.func @transform_8(%arg0: i32, %arg1: i32) -> (i32, i32) {
    %c0_i32 = arith.constant 0 : i32
    %c0_i32_0 = arith.constant 0 : i32
    %c0_i32_1 = arith.constant 0 : i32
    return %c0_i32, %c0_i32_0 : i32, i32
  }
  func.func @transform_9(%arg0: i32, %arg1: i32) -> (i32, i32, i32) {
    %c0_i32 = arith.constant 0 : i32
    %c0_i32_0 = arith.constant 0 : i32
    return %arg0, %arg1, %c0_i32 : i32, i32, i32
  }
  func.func @transform_10(%arg0: i32, %arg1: i32) -> (i32, i32, i32) {
    %c0_i32 = arith.constant 0 : i32
    %c0_i32_0 = arith.constant 0 : i32
    return %arg0, %arg1, %c0_i32 : i32, i32, i32
  }
  func.func @transform_11(%arg0: i32, %arg1: i32) -> (i32, i32, i32) {
    %c0_i32 = arith.constant 0 : i32
    %c0_i32_0 = arith.constant 0 : i32
    return %arg0, %arg1, %c0_i32 : i32, i32, i32
  }
}

</mosaic_0001>

<bundles_post_ra>
// kernel: tpu_custom_call.1
= control target key start
LH: loop header
LB: loop body
LE: loop exit
PB: predicated region body
PF: predicated region fallthrough
CT: control target
= control target key end

     0   :  { %s1935_s0 = inlined_call_operand.hbm [shape: f32[2,8,32], index: 0, kind: input, shape index: {}]   ;;  %s1936_s1 = inlined_call_operand.vmem [shape: f32[1,32], index: 1, kind: input, shape index: {}]   ;;  %s1937_s2 = inlined_call_operand.vmem [shape: f32[1,32], index: 2, kind: input, shape index: {}]   ;;  %s1938_s3 = inlined_call_operand.hbm [shape: f32[32,32], index: 3, kind: input, shape index: {}]   ;;  %s1939_s4 = inlined_call_operand.hbm [shape: f32[32,32], index: 4, kind: input, shape index: {}]   ;;  %s1940_s5 = inlined_call_operand.hbm [shape: f32[32,32], index: 5, kind: input, shape index: {}]   ;;  %s1941_s6 = inlined_call_operand.vmem [shape: f32[1,32], index: 6, kind: input, shape index: {}]   ;;  %s1942_s7 = inlined_call_operand.vmem [shape: f32[1,32], index: 7, kind: input, shape index: {}]   ;;  %s1943_s8 = inlined_call_operand.vmem [shape: f32[1,32], index: 8, kind: input, shape index: {}]   ;;  %s1944_s9 = inlined_call_operand.hbm [shape: f32[2,8,32], index: 9, kind: output, shape index: {0}]   ;;  %s1945_s10 = inlined_call_operand.hbm [shape: f32[2,8,32], index: 10, kind: output, shape index: {1}]   ;;  %s1946_s11 = inlined_call_operand.hbm [shape: f32[2,8,32], index: 11, kind: output, shape index: {2}]  }
   0x1   :  { %1957 = sst [smem:[#allocation21_spill]] %s1935_s0 }
   0x2   :  { %1958 = sst [smem:[#allocation22_spill]] %s1936_s1 }
   0x3   :  { %1959 = sst [smem:[#allocation23_spill]] %s1937_s2 }
   0x4   :  { %1960 = sst [smem:[#allocation24_spill]] %s1942_s7 }
   0x5   :  { %1961 = sst [smem:[#allocation25_spill]] %s1943_s8 }
   0x6   :  { %1962 = sst [smem:[#allocation26_spill]] %s1944_s9 }
   0x7   :  { %1963 = sst [smem:[#allocation27_spill]] %s1945_s10 }
   0x8   :  { %1964 = sst [smem:[#allocation28_spill]] %s1946_s11 }
   0x9   :  { %17 = vsyncpa [#allocation3], 0 }
   0xa   :  { %19 = vsyncpa [#allocation3 + $0x1], 0 }
   0xb   :  { %20 = vsyncpa [#allocation6], 0 }
   0xc   :  { %21 = vsyncpa [#allocation9], 0 }
   0xd   :  { %22 = vsyncpa [#allocation4], 0 }
   0xe   :  { %24 = vsyncpa [#allocation4 + $0x1], 0 }
   0xf   :  { %25 = vsyncpa [#allocation12], 0 }
  0x10   :  { %27 = vsyncpa [#allocation12 + $0x1], 0  ;;  %s1548_s17 = smov 0   ;;  %s1550_s18 = smov 0  }
  0x11   :  { %s1552_s19 = smov 0   ;;  %s1554_s20 = smov 0  }
  0x12   :  { %s1556_s21 = smov 0   ;;  %s1558_s22 = smov 0  }
  0x13 LB: > { %1965 = sst [smem:[#allocation19_spill]] %s1454_s17  ;;  %s1579_s23 = sadd.s32 4294967295, %s1474_s22   ;;  %s1474_s22 = sphi %s1558_s22, %s33_s22   ;;  %s1470_s21 = sphi %s1556_s21, %s2001_s21   ;;  %s1466_s20 = sphi %s1554_s20, %s2000_s20   ;;  %s1462_s19 = sphi %s1552_s19, %s1999_s19   ;;  %s1458_s18 = sphi %s1550_s18, %s1998_s18   ;;  %s1454_s17 = sphi %s1548_s17, %s1997_s17  }
  0x14   : > { %s1947_s24 = sadd.s32 4294967294, %s1474_s22   ;;  %p67_p0 = scmp.ne.s32.totalorder %s1458_s18, %s1454_s17 }
  0x15   : > { %p1951_p1 = scmp.eq.s32.totalorder %s1579_s23, 0  ;;  %p267_p3 = scmp.eq.s32.totalorder %s1947_s24, 1 }
  0x16   : > { %p1001_p5 = scmp.ge.s32.totalorder %s1474_s22, 1  ;;  %p330_p7 = scmp.lt.s32.totalorder %s1474_s22, 3 }
  0x17   : > { %p1590_p4 = por %p1951_p1, %p67_p0  ;;  %p1595_p6 = por %p267_p3, %p67_p0 }
  0x18   : > { %p1600_p8 = pnand %p1001_p5, %p330_p7  ;;  %s1476_s28 = smov [#allocation5]  }
  0x19   : > { %s1966_s25 = scalar_select %p1590_p4, 1, 0 }
  0x1a   : > { %s1967_s26 = scalar_select %p1595_p6, 1, 0 }
  0x1b   : > { %s1969_s27 = scalar_select %p1600_p8, 1, 0 }
  0x1c   : > { %1968 = sst [smem:[#allocation20_spill]] %s1967_s26  ;;  %s348_s29 = sshll.u32 %s1476_s28, 4  ;;  %s1604_s29 = int_to_ptr.vmem [resolvable:$true] %s348_s29 }
  0x1d   : > { %p1118_p9 = pneg %p1600_p8  ;;  %s1477_s12 = smov [#allocation7]  }
  0x1e   : > { %s361_s13 = sshll.u32 %s1477_s12, 4  ;;  %s1478_s14 = smov [#allocation8]   ;;  %s1615_s13 = int_to_ptr.vmem [resolvable:$true] %s361_s13 }
  0x1f   : > { %p1611_p11 = pnand %p1118_p9, %p1951_p1  ;;  %s1617_s15 = sshll.u32 %s1478_s14, 4  ;;  %s375_s15 = int_to_ptr.vmem [resolvable:$true] %s1617_s15 }
  0x20   : > { %s1210_s24 = scalar_lea.hbm %s1938_s3, 512 }
  0x21   : > { %p1211_p12 = scmp.ne.s32.totalorder %s1938_s3, %s1210_s24  ;;  %p1627_p13 = pneg %p1611_p11 }
  0x22   : > { %p1217_p5 = scmp.lt.u32.totalorder %s1210_s24, %s1938_s3 }
  0x23   : > { %p1213_p0 = pnand %p1627_p13, %p1211_p12 }
  0x25   : > { %p1214_p3 = pneg %p1213_p0 }
  0x27   : > { %p1219_p7 = pnand %p1217_p5, %p1214_p3 }
  0x29   : > { %1222 = shalt.err (!%p1219_p7)
}
  0x2a   : > { %s1223_s17 = scalar_lea.vmem %s1604_s29, 512  ;;  %p1231_p2 = scmp.lt.s32.totalorder %s1604_s29, %s1604_s29 }
  0x2b   : > { %p1224_p9 = scmp.ne.s32.totalorder %s1604_s29, %s1223_s17  ;;  %p1232_p6 = scmp.lt.s32.totalorder %s1223_s17, %s1223_s17 }
  0x2d   : > { %p1226_p10 = pnand %p1224_p9, %p1627_p13  ;;  %p1233_p12 = por %p1232_p6, %p1231_p2 }
  0x2f   : > { %p1227_p1 = pneg %p1226_p10 }
  0x31   : > { %p1234_p0 = pnand %p1233_p12, %p1227_p1 }
  0x33   : > { %1237 = shalt.err (!%p1234_p0)
}
  0x34   : > { %s1479_s26 = smov 128   ;;  %s1480_s24 = smov 8  }
  0x35   : > { %1121 = dma.hbm_to_vmem [thread:$0]  (!%p1611_p11), %s1938_s3, 512, %s1604_s29, [#allocation6], %s1479_s26, %s1479_s26, %s1480_s24  }
  0x36   : > { %s1238_s17 = scalar_lea.hbm %s1939_s4, 512 }
  0x37   : > { %p1239_p1 = scmp.ne.s32.totalorder %s1939_s4, %s1238_s17  ;;  %p1245_p10 = scmp.lt.u32.totalorder %s1238_s17, %s1939_s4 }
  0x39   : > { %p1241_p2 = pnand %p1239_p1, %p1627_p13 }
  0x3b   : > { %p1242_p6 = pneg %p1241_p2 }
  0x3d   : > { %p1247_p3 = pnand %p1245_p10, %p1242_p6 }
  0x3f   : > { %1250 = shalt.err (!%p1247_p3)
}
  0x40   : > { %s1251_s29 = scalar_lea.vmem %s1615_s13, 512  ;;  %p1259_p12 = scmp.lt.s32.totalorder %s1615_s13, %s1615_s13 }
  0x41   : > { %p1252_p5 = scmp.ne.s32.totalorder %s1615_s13, %s1251_s29  ;;  %p1260_p0 = scmp.lt.s32.totalorder %s1251_s29, %s1251_s29 }
  0x43   : > { %p1254_p7 = pnand %p1252_p5, %p1627_p13  ;;  %p1261_p1 = por %p1260_p0, %p1259_p12 }
  0x45   : > { %p1255_p9 = pneg %p1254_p7 }
  0x47   : > { %p1262_p2 = pnand %p1261_p1, %p1255_p9 }
  0x49   : > { %1265 = shalt.err (!%p1262_p2)
}
  0x4a   : > { %1124 = dma.hbm_to_vmem [thread:$0]  (!%p1611_p11), %s1939_s4, 512, %s1615_s13, [#allocation6], %s1479_s26, %s1479_s26, %s1480_s24  }
  0x4b   : > { %s1266_s16 = scalar_lea.hbm %s1940_s5, 512 }
  0x4c   : > { %p1267_p6 = scmp.ne.s32.totalorder %s1940_s5, %s1266_s16  ;;  %p1273_p5 = scmp.lt.u32.totalorder %s1266_s16, %s1940_s5 }
  0x4e   : > { %p1269_p10 = pnand %p1267_p6, %p1627_p13 }
  0x50   : > { %p1270_p3 = pneg %p1269_p10 }
  0x52   : > { %p1275_p7 = pnand %p1273_p5, %p1270_p3 }
  0x54   : > { %1278 = shalt.err (!%p1275_p7)
}
  0x55   : > { %s1279_s29 = scalar_lea.vmem %s375_s15, 512  ;;  %p1287_p1 = scmp.lt.s32.totalorder %s375_s15, %s375_s15 }
  0x56   : > { %p1280_p9 = scmp.ne.s32.totalorder %s375_s15, %s1279_s29  ;;  %p1288_p2 = scmp.lt.s32.totalorder %s1279_s29, %s1279_s29 }
  0x58   : > { %p1282_p12 = pnand %p1280_p9, %p1627_p13  ;;  %p1289_p4 = por %p1288_p2, %p1287_p1 }
  0x5a   : > { %p1283_p0 = pneg %p1282_p12 }
  0x5c   : > { %p1290_p8 = pnand %p1289_p4, %p1283_p0 }
  0x5e   : > { %1293 = shalt.err (!%p1290_p8)
}
  0x5f   : > { %1127 = dma.hbm_to_vmem [thread:$0]  (!%p1611_p11), %s1940_s5, 512, %s375_s15, [#allocation9], %s1479_s26, %s1479_s26, %s1480_s24  }
  0x60   : > { %s54_s11 = sadd.s32 1, %s1462_s19  ;;  %s45_s30 = sadd.s32 1, %s1470_s21 }
  0x61   : > { %p61_p4 = scmp.ne.s32.totalorder %s1462_s19, %s1458_s18  ;;  %p47_p8 = scmp.ge.s32.totalorder %s45_s30, 2 }
  0x62   : > { %p62_p13 = scmp.eq.s32.totalorder %s1474_s22, 0  ;;  %p1972_p6 = scmp.eq.s32.totalorder %s1579_s23, 1 }
  0x63   : > { %p1145_p3 = scmp.lt.s32.totalorder %s1474_s22, 2  ;;  %s2003_s30 = smov (%p47_p8, %s45_s30), 0 }
  0x64   : > { %p1706_p10 = por %p1972_p6, %p61_p4  ;;  %p63_p5 = por %p62_p13, %p61_p4 }
  0x65   : > { %s397_s9 = sand.u32 1, %s1462_s19   ;;  %s49_s10 = ssub.s32 %s1470_s21, %s2003_s30 }
  0x66   : > { %p52_p7 = scmp.eq.s32.totalorder %s49_s10, 0  ;;  %s1006_s15 = sshll.u32 %s397_s9, 3 }
  0x67   : > { %s1007_s26 = sshll.u32 %s1470_s21, 7  ;;  %s1974_s0 = sld [smem:[#allocation21_spill]] }
  0x68   : > { %s1718_s24 = scalar_select %p52_p7, %s1462_s19, %s54_s11  }
  0x69   : > { %s401_s14 = scalar_lea.vmem [#allocation2], %s1006_s15  ;;  %p1729_p11 = pnand %p1145_p3, %p63_p5 }
  0x6a   : > { %s409_s17 = sshll.u32 %s401_s14, 4  ;;  %s398_s13 = scalar_lea.sflag [#allocation3], %s397_s9  ;;  %s1725_s17 = int_to_ptr.vmem [resolvable:$true] %s409_s17 }
  0x6b   : > { %p1296_p12 = pneg %p1729_p11 }
  0x6d   : > { %s1723_s12 = scalar_lea.hbm %s1974_s0, %s1007_s26  ;;  %s1299_s15 = scalar_lea.hbm %s1974_s0, 256 }
  0x6e   : > { %s1294_s7 = scalar_lea.hbm %s1723_s12, 128  ;;  %p1300_p2 = scmp.lt.u32.totalorder %s1723_s12, %s1974_s0 }
  0x6f   : > { %p1295_p9 = scmp.ne.s32.totalorder %s1723_s12, %s1294_s7  ;;  %p1301_p4 = scmp.lt.u32.totalorder %s1299_s15, %s1294_s7 }
  0x70   : > { %p1303_p13 = scmp.lt.u32.totalorder %s1294_s7, %s1723_s12 }
  0x71   : > { %p1297_p0 = pnand %p1296_p12, %p1295_p9  ;;  %p1302_p8 = por %p1301_p4, %p1300_p2 }
  0x73   : > { %p1298_p1 = pneg %p1297_p0  ;;  %p1304_p6 = por %p1303_p13, %p1302_p8 }
  0x75   : > { %p1305_p3 = pnand %p1304_p6, %p1298_p1 }
  0x77   : > { %1308 = shalt.err (!%p1305_p3)
}
  0x78   : > { %s1309_s9 = scalar_lea.vmem %s1725_s17, 128  ;;  %s1481_s28 = smov [#allocation2]  }
  0x79   : > { %p1310_p5 = scmp.ne.s32.totalorder %s1725_s17, %s1309_s9  ;;  %s1314_s14 = sshll.u32 %s1481_s28, 4  ;;  %s1315_s14 = int_to_ptr.vmem [resolvable:$false] %s1314_s14 }
  0x7a   : > { %s1316_s11 = scalar_lea.vmem %s1315_s14, 256  ;;  %p1317_p0 = scmp.lt.s32.totalorder %s1725_s17, %s1315_s14 }
  0x7b   : > { %p1312_p7 = pnand %p1310_p5, %p1296_p12  ;;  %p1318_p2 = scmp.lt.s32.totalorder %s1316_s11, %s1309_s9 }
  0x7d   : > { %p1313_p9 = pneg %p1312_p7  ;;  %p1319_p4 = por %p1318_p2, %p1317_p0 }
  0x7f   : > { %p1320_p8 = pnand %p1319_p4, %p1313_p9 }
  0x81   : > { %1323 = shalt.err (!%p1320_p8)
}
  0x82   : > { %1131 = dma.hbm_to_vmem [thread:$0]  (!%p1729_p11), %s1723_s12, 128, %s1725_s17, %s398_s13  }
  0x83   : > { %p1976_p1 = scmp.ne.s32.totalorder %s1969_s27, 0 }
  0x84   : > { %s1761_s7 = sand.u32 (!%p1976_p1), 1, %s1458_s18   ;;  %p1977_p12 = scmp.ne.s32.totalorder (!%p1976_p1), %s1966_s25, 0 }
  0x85   : > { %418 = sbr.rel (%p1976_p1) target bundleno = 753 (0x2f1), region = 56  ;;  %s1764_s10 = sshll.u32 (!%p1976_p1), %s1761_s7, 3 }
  0x86   : > { %s421_s15 = scalar_lea.sflag (!%p1976_p1), [#allocation3], %s1761_s7  ;;  %s424_s26 = scalar_lea.vmem (!%p1976_p1), [#allocation2], %s1764_s10 }
  0x8c   : > { %1433 = dma.done.wait (%p1977_p12), %s421_s15, 128  }
  0x8d   : > { %1435 = vsyncadd (%p1977_p12), %s421_s15, 4294967168  ;;  %p1978_p11 = scmp.eq.s32.totalorder %s1579_s23, 0 }
  0x8f   : > { %1437 = dma.done.wait (%p1978_p11), [#allocation6], 1024   ;;  %p1979_p13 = pmov %p1978_p11 }
  0x90   : > { %p1980_p6 = pmov %p1978_p11 }
  0x91   : > { %1439 = vsyncadd (%p1979_p13), [#allocation6], 4294966272 }
  0x92   : > { %1441 = dma.done.wait (%p1980_p6), [#allocation9], 512   ;;  %p1981_p3 = pmov %p1980_p6 }
  0x93   : > { %vm486_vm0 = vcmask 261120   ;;  %v485_v0 = vld [vmem:[%s424_s26] sm:$0xff]  ;;  %v524_v7 = vld [vmem:[#allocation5] sm:$0xff]  ;;  %v525_v8 = vld [vmem:[#allocation5 + $0x8] sm:$0xff]  ;;  %v1482_v10 = vmov 0.0|0.0   ;;  %vm1483_vm1 = vmmov 0  }
  0x94   : > { %1443 = vsyncadd (%p1981_p3), [#allocation9], 4294966784  ;;  %v487_v1 = vsel %vm486_vm0, %v485_v0, 0.0  ;;  %v608_v9 = vld [vmem:[#allocation7] sm:$0xff]  ;;  %1080 = vmatprep.subr.bf16.mxu0 %v1482_v10  ;;  %v1081_v11 = vpack.c.bf16 %v525_v8, %v524_v7  ;;  %1086 = vmatprep.subr.bf16.mxu1 %v1482_v10  ;;  %v609_v12 = vld [vmem:[#allocation7 + $0x8] sm:$0xff]  ;;  %v1484_v18 = vmov 0.0  }
  0x95   : > { %488 = vadd.xlane.f32.xlu0 %v487_v1  ;;  %v526_v13 = vld [vmem:[#allocation5 + $0x10] sm:$0xff]  ;;  %v527_v14 = vld [vmem:[#allocation5 + $0x18] sm:$0xff]  ;;  %v1087_v15 = vpack.c.bf16 %v609_v12, %v608_v9  ;;  %1055 = vmatprep.mubr.msk.f32.mxu0 %vm1483_vm1, %v1484_v18  ;;  %s1982_s1 = sld [smem:[#allocation22_spill]]  ;;  %v689_v32 = vld [vmem:[#allocation8] sm:$0xff]  ;;  %s1983_s2 = sld [smem:[#allocation23_spill]] }
  0x96   : > { %v610_v16 = vld [vmem:[#allocation7 + $0x10] sm:$0xff]  ;;  %v611_v17 = vld [vmem:[#allocation7 + $0x18] sm:$0xff]  ;;  %1066 = vmatprep.mubr.msk.f32.mxu1 %vm1483_vm1, %v1484_v18  ;;  %1082 = vmatpush3.bf16.msra.mxu0 %v1081_v11  ;;  %v1084_v19 = vpack.c.bf16 %v527_v14, %v526_v13  ;;  %v690_v33 = vld [vmem:[#allocation8 + $0x8] sm:$0xff]  ;;  %s779_s29 = sand.u32 1, %s1579_s23   ;;  %s1984_s14 = sld [smem:[#allocation24_spill]] }
  0x97   : > { %1088 = vmatpush3.bf16.msra.mxu1 %v1087_v15  ;;  %1083 = vmatprep.subr.bf16.mxu0 %v1482_v10  ;;  %v1090_v20 = vpack.c.bf16 %v611_v17, %v610_v16  ;;  %v1093_v36 = vpack.c.bf16 %v690_v33, %v689_v32  ;;  %v691_v38 = vld [vmem:[#allocation8 + $0x10] sm:$0xff]  ;;  %v692_v39 = vld [vmem:[#allocation8 + $0x18] sm:$0xff]  ;;  %s1802_s11 = sshll.u32 %s1466_s20, 7  ;;  %s477_s15 = scalar_lea.vmem [#allocation11], %s1764_s10 }
  0x98   : > { %1089 = vmatprep.subr.bf16.mxu1 %v1482_v10  ;;  %v1096_v40 = vpack.c.bf16 %v692_v39, %v691_v38  ;;  %v1018_v41 = vld [vmem:[%s1941_s6] ss:$0 sm:$0xff]  ;;  %s813_s26 = sshll.u32 %s477_s15, 4  ;;  %s1956_s25 = scalar_lea.vmem [#allocation10], %s1764_s10  ;;  %s1814_s26 = int_to_ptr.vmem [resolvable:$true] %s813_s26 }
  0x99   : > { %s799_s23 = sshll.u32 %s1956_s25, 4  ;;  %s1985_s17 = sld [smem:[#allocation27_spill]]  ;;  %s1823_s23 = int_to_ptr.vmem [resolvable:$true] %s799_s23 }
  0x9a   : > { %1085 = vmatpush3.bf16.msra.mxu0 %v1084_v19  ;;  %s1987_s28 = sld [smem:[#allocation26_spill]]  ;;  %s1825_s25 = scalar_lea.sflag [#allocation12], %s779_s29 }
  0x9b   : > { %1091 = vmatpush3.bf16.msra.mxu1 %v1090_v20  ;;  %1092 = vmatprep.subr.bf16.mxu0 %v1482_v10  ;;  %v1016_v30 = vld [vmem:[%s1982_s1] ss:$0 sm:$0xff]  ;;  %s1324_s27 = scalar_lea.vmem %s1814_s26, 128  ;;  %s1485_s12 = smov [#allocation11]  }
  0x9c   : > { %v1017_v34 = vld [vmem:[%s1983_s2] ss:$0 sm:$0xff]  ;;  %p1325_p5 = scmp.ne.s32.totalorder %s1814_s26, %s1324_s27 }
  0x9d   : > { %v1020_v42 = vld [vmem:[%s1984_s14] ss:$0 sm:$0xff] }
  0x9e   : > { %p1326_p7 = pnand %p1325_p5, %p1706_p10 }
  0x9f   : > { %s1986_s13 = smov %s1985_s17  ;;  %s1812_s16 = scalar_lea.hbm %s1985_s17, %s1802_s11 }
  0xa0   : > { %s1821_s14 = scalar_lea.hbm %s1987_s28, %s1802_s11  ;;  %p1327_p9 = pneg %p1326_p7 }
  0xa1   : > { %s1328_s17 = sshll.u32 %s1485_s12, 4  ;;  %s1329_s17 = int_to_ptr.vmem [resolvable:$false] %s1328_s17 }
  0xa2   : > { %s1330_s0 = scalar_lea.vmem %s1329_s17, 256  ;;  %p1331_p0 = scmp.lt.s32.totalorder %s1814_s26, %s1329_s17 }
  0xa3   : > { %p1332_p2 = scmp.lt.s32.totalorder %s1330_s0, %s1324_s27 }
  0xa5   : > { %p1333_p4 = por %p1332_p2, %p1331_p0 }
  0xa7   : > { %p1334_p8 = pnand %p1333_p4, %p1327_p9 }
 0x122   : > { %v489_v2 = vpop.xlane.xlu0 %488 }
 0x123   : > { %v491_v3 = vmul.f32 0.03125, %v489_v2 }
 0x125   : > { %v492_v4 = vsub.f32 %v485_v0, %v491_v3 }
 0x127   : > { %v493_v5 = vmul.f32 %v492_v4, %v492_v4 }
 0x129   : > { %v494_v6 = vsel %vm486_vm0, %v493_v5, 0.0 }
 0x12a   : > { %495 = vadd.xlane.f32.xlu0 %v494_v6 }
 0x1b7   : > { %v496_v21 = vpop.xlane.xlu0 %495 }
 0x1b8   : > { %v497_v22 = vmul.f32 0.03125, %v496_v21 }
 0x1ba   : > { %v498_v23 = vadd.f32 1e-05, %v497_v22 }
 0x1bc   : > { %1206 = vrsqrt.f32 %v498_v23  ;;  %vm501_vm2 = vcmp.eq.f32.partialorder %v498_v23, inf  ;;  %v504_v26 = vand.u32 2147483648, %v498_v23  ;;  %vm503_vm3 = vcmp.eq.f32.partialorder %v498_v23, 0.0 }
 0x1c6   : > { %v1207_v24 = vpop.eup %1206 }
 0x1c7   : > { %v500_v25 = vmul.f32 %v1207_v24, %v498_v23 }
 0x1c9   : > { %v502_v27 = vsel %vm501_vm2, %v498_v23, %v500_v25 }
 0x1ca   : > { %v505_v28 = vsel %vm503_vm3, %v504_v26, %v502_v27 }
 0x1cb   : > { %1208 = vrcp.f32 %v505_v28 }
 0x1d5   : > { %v1209_v29 = vpop.eup %1208 }
 0x1d6   : > { %v507_v31 = vmul.f32 %v1209_v29, %v492_v4 }
 0x1d8   : > { %v515_v35 = vmul.f32 %v1016_v30, %v507_v31 }
 0x1da   : > { %v523_v37 = vadd.f32 %v1017_v34, %v515_v35 }
 0x1dc   : > { %1056 = vmatmul.mubr.msk.f32.vlgmr.msra.gmra.mrb[0].mxu0 %vm486_vm0, %v523_v37  ;;  %1067 = vmatmul.mubr.msk.f32.vlgmr.msra.gmra.mrb[0].mxu1 %vm486_vm0, %v523_v37 }
 0x1dd   : > { %1094 = vmatpush3.bf16.msra.mxu0 %v1093_v36  ;;  %1077 = vmatprep.mubr.msk.f32.mxu0 %vm1483_vm1, %v1484_v18 }
 0x1de   : > { %1095 = vmatprep.subr.bf16.mxu0 %v1482_v10 }
 0x1e1   : > { %1097 = vmatpush3.bf16.msra.mxu0 %v1096_v40 }
 0x1e4   : > { %1078 = vmatmul.mubr.msk.f32.vlgmr.msra.gmra.mrb[2].mxu0 %vm486_vm0, %v523_v37 }
 0x2af   : > { %v604_v43 = vpop.f32.mrb[0].mxu0  ;;  %v685_v44 = vpop.f32.mrb[0].mxu1 }
 0x2b0   : > { %v605_v45 = vadd.f32 %v1018_v41, %v604_v43  ;;  %v686_v46 = vadd.f32 %v1020_v42, %v685_v44  ;;  %v1057_v47 = vpop.f32.mrb[1].mxu0  ;;  %v1068_v48 = vpop.f32.mrb[1].mxu1 }
 0x2b2   : > { %v770_v49 = vmul.f32 0.35355338, %v605_v45  ;;  %772 = vst.msk [vmem:[%s477_s15] sm:$0xff] %vm486_vm0, %v686_v46 }
 0x2b3   : > { %1337 = shalt.err (!%p1334_p8)
}
 0x2b4   : > { %s1338_s29 = scalar_lea.hbm %s1812_s16, 128  ;;  %s1342_s9 = scalar_lea.hbm %s1986_s13, 256 }
 0x2b5   : > { %p1339_p1 = scmp.ne.s32.totalorder %s1812_s16, %s1338_s29  ;;  %p1343_p13 = scmp.lt.u32.totalorder %s1812_s16, %s1986_s13 }
 0x2b6   : > { %p1344_p6 = scmp.lt.u32.totalorder %s1342_s9, %s1338_s29  ;;  %p1346_p5 = scmp.lt.u32.totalorder %s1338_s29, %s1812_s16 }
 0x2b7   : > { %p1340_p12 = pnand %p1339_p1, %p1706_p10 }
 0x2b8   : > { %p1345_p3 = por %p1344_p6, %p1343_p13 }
 0x2b9   : > { %p1341_p11 = pneg %p1340_p12 }
 0x2ba   : > { %p1347_p7 = por %p1346_p5, %p1345_p3 }
 0x2bc   : > { %p1348_p9 = pnand %p1347_p7, %p1341_p11 }
 0x2be   : > { %1351 = shalt.err (!%p1348_p9)
}
 0x2bf   : > { %1113 = dma.vmem_to_hbm [thread:$0]  (%p1706_p10), %s1814_s26, 128, %s1812_s16, %s1825_s25  }
 0x2c0   : > { %s1988_s0 = scalar_lea.vmem [#allocation10], %s1764_s10  ;;  %s484_s27 = scalar_lea.vmem [#allocation13], %s1764_s10 }
 0x2c1   : > { %771 = vst.msk [vmem:[%s1988_s0] sm:$0xff] %vm486_vm0, %v770_v49  ;;  %s1855_s29 = sshll.u32 %s484_s27, 4  ;;  %s1989_s9 = sld [smem:[#allocation25_spill]]  ;;  %s828_s29 = int_to_ptr.vmem [resolvable:$true] %s1855_s29 }
 0x2c2   : > { %s775_s12 = scalar_lea.sflag [#allocation4], %s1761_s7  ;;  %s1352_s17 = scalar_lea.vmem %s1823_s23, 128 }
 0x2c3   : > { %p1353_p0 = scmp.ne.s32.totalorder %s1823_s23, %s1352_s17  ;;  %s1486_s1 = smov [#allocation10]  }
 0x2c4   : > { %s1356_s2 = sshll.u32 %s1486_s1, 4  ;;  %s1357_s2 = int_to_ptr.vmem [resolvable:$false] %s1356_s2 }
 0x2c5   : > { %p1354_p2 = pnand %p1353_p0, %p1706_p10  ;;  %s1358_s26 = scalar_lea.vmem %s1357_s2, 256 }
 0x2c6   : > { %p1359_p8 = scmp.lt.s32.totalorder %s1823_s23, %s1357_s2  ;;  %p1360_p1 = scmp.lt.s32.totalorder %s1358_s26, %s1352_s17 }
 0x2c7   : > { %v1022_v50 = vld [vmem:[%s1989_s9] ss:$0 sm:$0xff]  ;;  %p1355_p4 = pneg %p1354_p2 }
 0x2c8   : > { %p1361_p12 = por %p1360_p1, %p1359_p8 }
 0x2ca   : > { %p1362_p11 = pnand %p1361_p12, %p1355_p4 }
 0x2cc   : > { %1365 = shalt.err (!%p1362_p11)
}
 0x2cd   : > { %s1366_s7 = scalar_lea.hbm %s1821_s14, 128  ;;  %s1370_s1 = scalar_lea.hbm %s1987_s28, 256 }
 0x2ce   : > { %p1367_p13 = scmp.ne.s32.totalorder %s1821_s14, %s1366_s7  ;;  %p1371_p5 = scmp.lt.u32.totalorder %s1821_s14, %s1987_s28 }
 0x2cf   : > { %p1372_p7 = scmp.lt.u32.totalorder %s1370_s1, %s1366_s7  ;;  %p1374_p0 = scmp.lt.u32.totalorder %s1366_s7, %s1821_s14 }
 0x2d0   : > { %p1368_p6 = pnand %p1367_p13, %p1706_p10 }
 0x2d1   : > { %p1373_p9 = por %p1372_p7, %p1371_p5 }
 0x2d2   : > { %p1369_p3 = pneg %p1368_p6 }
 0x2d3   : > { %p1375_p2 = por %p1374_p0, %p1373_p9 }
 0x2d5   : > { %p1376_p4 = pnand %p1375_p2, %p1369_p3 }
 0x2d7   : > { %1379 = shalt.err (!%p1376_p4)
}
 0x2d8   : > { %1112 = dma.vmem_to_hbm [thread:$0]  (%p1706_p10), %s1823_s23, 128, %s1821_s14, %s775_s12   ;;  %v766_v51 = vpop.f32.mrb[2].mxu0 }
 0x2d9   : > { %v767_v52 = vadd.f32 %v1022_v50, %v766_v51  ;;  %v1079_v53 = vpop.f32.mrb[3].mxu0  ;;  %s1990_s17 = sld [smem:[#allocation28_spill]]  ;;  %s1380_s7 = scalar_lea.vmem %s828_s29, 128 }
 0x2da   : > { %p1381_p8 = scmp.ne.s32.totalorder %s828_s29, %s1380_s7  ;;  %s1487_s0 = smov [#allocation13]  }
 0x2db   : > { %773 = vst.msk [vmem:[%s484_s27] sm:$0xff] %vm486_vm0, %v767_v52  ;;  %s1384_s1 = sshll.u32 %s1487_s0, 4  ;;  %s1385_s1 = int_to_ptr.vmem [resolvable:$false] %s1384_s1 }
 0x2dc   : > { %p1382_p1 = pnand %p1381_p8, %p1706_p10  ;;  %s1386_s23 = scalar_lea.vmem %s1385_s1, 256 }
 0x2dd   : > { %p1387_p11 = scmp.lt.s32.totalorder %s828_s29, %s1385_s1  ;;  %p1388_p13 = scmp.lt.s32.totalorder %s1386_s23, %s1380_s7 }
 0x2de   : > { %p1383_p12 = pneg %p1382_p1 }
 0x2df   : > { %s1991_s26 = smov %s1990_s17  ;;  %s1886_s16 = scalar_lea.hbm %s1990_s17, %s1802_s11 }
 0x2e0   : > { %p1389_p6 = por %p1388_p13, %p1387_p11 }
 0x2e2   : > { %p1390_p3 = pnand %p1389_p6, %p1383_p12 }
 0x2e4   : > { %1393 = shalt.err (!%p1390_p3)
}
 0x2e5   : > { %s1394_s10 = scalar_lea.hbm %s1886_s16, 128  ;;  %s1398_s27 = scalar_lea.hbm %s1991_s26, 256 }
 0x2e6   : > { %p1395_p5 = scmp.ne.s32.totalorder %s1886_s16, %s1394_s10  ;;  %p1399_p0 = scmp.lt.u32.totalorder %s1886_s16, %s1991_s26 }
 0x2e7   : > { %p1400_p2 = scmp.lt.u32.totalorder %s1398_s27, %s1394_s10  ;;  %p1402_p8 = scmp.lt.u32.totalorder %s1394_s10, %s1886_s16 }
 0x2e8   : > { %p1396_p7 = pnand %p1395_p5, %p1706_p10 }
 0x2e9   : > { %p1401_p4 = por %p1400_p2, %p1399_p0 }
 0x2ea   : > { %p1397_p9 = pneg %p1396_p7 }
 0x2eb   : > { %p1403_p1 = por %p1402_p8, %p1401_p4 }
 0x2ed   : > { %p1404_p12 = pnand %p1403_p1, %p1397_p9 }
 0x2ef   : > { %1407 = shalt.err (!%p1404_p12)
}
 0x2f0   : > { %1114 = dma.vmem_to_hbm [thread:$0]  (%p1706_p10), %s828_s29, 128, %s1886_s16, %s1825_s25  }
 0x2f1 PF: > { %s1992_s2 = sld [smem:[#allocation19_spill]]  ;;  %s1993_s20 = sld [smem:[#allocation20_spill]] }
 0x2f2   : > { %p1995_p13 = scmp.ge.s32.totalorder %s1474_s22, 2 }
 0x2f7   : > { %s839_s9 = sand.u32 1, %s1992_s2   ;;  %p1994_p11 = scmp.ne.s32.totalorder %s1993_s20, 0 }
 0x2f8   : > { %s840_s17 = scalar_lea.sflag [#allocation4], %s839_s9 }
 0x2f9   : > { %p1133_p6 = pnand %p1995_p13, %p1994_p11 }
 0x2fb   : > { %1445 = dma.done.wait (!%p1133_p6), %s840_s17, 128  }
 0x2fc   : > { %1447 = vsyncadd (!%p1133_p6), %s840_s17, 4294967168  ;;  %s1996_s7 = sadd.s32 4294967294, %s1474_s22  }
 0x2fd   : > { %s848_s0 = sand.u32 1, %s1996_s7  }
 0x2fe   : > { %s849_s1 = scalar_lea.sflag [#allocation12], %s848_s0 }
 0x2ff   : > { %1449 = dma.done.wait (!%p1133_p6), %s849_s1, 256  }
 0x300   : > { %1451 = vsyncadd (!%p1133_p6), %s849_s1, 4294967040  ;;  %s33_s22 = sadd.s32 1, %s1474_s22   ;;  %s1997_s17 = smov %s1458_s18 }
 0x301   : > { %p30_p10 = scmp.ge.s32.totalorder %s33_s22, 4   ;;  %s1998_s18 = smov %s1462_s19 }
 0x302   : > { %s1999_s19 = smov %s1718_s24  ;;  %s2000_s20 = smov %s1470_s21 }
 0x303   : > { %s2001_s21 = smov %s2003_s30  ;;  %32 = sbr.rel (!%p30_p10) target bundleno = 19 (0x13), region = 145 }
 0x30a   :  { %863 = vsyncpa [#allocation3], 1 }
 0x30b   :  { %865 = vsyncpa [#allocation3 + $0x1], 1 }
 0x30c   :  { %866 = vsyncpa [#allocation6], 1 }
 0x30d   :  { %867 = vsyncpa [#allocation9], 1 }
 0x30e   :  { %868 = vsyncpa [#allocation4], 1 }
 0x30f   :  { %870 = vsyncpa [#allocation4 + $0x1], 1 }
 0x310   :  { %871 = vsyncpa [#allocation12], 1 }
 0x311   :  { %873 = vsyncpa [#allocation12 + $0x1], 1 }

</bundles_post_ra>
